<compile_context>
chip_gen: v5e
topology: v5e:2x2
jax: 0.10.0
libtpu: 0.0.40
codegen_flags: <defaults>
</compile_context>

<pallas_src>
import math
import jax
import jax.numpy as jnp
from jax import lax
from jax.experimental import pallas as pl
from jax.experimental.pallas import tpu as pltpu

LN_EPS = 1e-5
_INV_SQRT2 = 1.0 / math.sqrt(2.0)


def mlp_block_kernel(x_ref, gamma_ref, beta_ref, w1_ref, b1_ref, w2_ref, b2_ref,
                     o_ref, xn_ref):
    k = pl.program_id(1)

    @pl.when(k == 0)
    def _():
        # LayerNorm in f32 (biased variance, eps=1e-5, matching nn.LayerNorm).
        x = x_ref[...].astype(jnp.float32)
        mean = jnp.mean(x, axis=-1, keepdims=True)
        centered = x - mean
        var = jnp.mean(centered * centered, axis=-1, keepdims=True)
        xn = centered * lax.rsqrt(var + LN_EPS)
        xn = xn * gamma_ref[...] + beta_ref[...]
        xn_ref[...] = xn.astype(xn_ref.dtype)        # bf16 MXU operand, reused across k
        o_ref[...] = jnp.zeros_like(o_ref)           # f32 output tile doubles as accumulator

    # Linear 1, hidden-dim chunk: (tm, E) @ (E, tn) -> (tm, tn), f32 accumulation.
    h = jnp.dot(xn_ref[...], w1_ref[...], preferred_element_type=jnp.float32)
    h = h + b1_ref[...]

    # Exact-erf GELU (matches nn.GELU() default).  Dropout(p=0.1) is identity at eval.
    h = 0.5 * h * (1.0 + lax.erf(h * _INV_SQRT2))

    # Linear 2, chunk contribution: (tm, tn) @ (tn, E) accumulated into the resident out tile.
    o_ref[...] += jnp.dot(h.astype(jnp.bfloat16), w2_ref[...],
                          preferred_element_type=jnp.float32)

    @pl.when(k == pl.num_programs(1) - 1)
    def _():
        o_ref[...] = o_ref[...] + b2_ref[...]


def _round_up(a, b):
    return ((a + b - 1) // b) * b


def _est_vmem_bytes(tm, tn, E):
    # Double-buffered streamed tiles + single resident xn scratch.
    return (2 * (tm * E * 2            # x tile (bf16)
                 + tm * E * 4          # out tile / accumulator (f32)
                 + E * tn * 2          # W1 tile (bf16)
                 + tn * E * 2          # W2 tile (bf16)
                 + tn * 4 + 3 * E * 4)  # b1 / gamma / beta / b2 rows
            + tm * E * 2)              # xn scratch (bf16)


def _chip_defaults():
    """(physical VMEM bytes, default tm, default tn, usable VMEM budget)."""
    vmem_phys = 128 << 20
    try:
        vmem_phys = int(pltpu.get_tpu_info().vmem_capacity_bytes)
    except Exception:
        pass
    if vmem_phys <= (64 << 20) + (1 << 20):
        # v7x-class: 64 MiB per TensorCore -> leave ~15% headroom for compiler scratch.
        return vmem_phys, 384, 512, int(vmem_phys * 0.85)
    # v5e / v6e: 128 MiB physical -> allow up to ~110 MiB.
    return vmem_phys, 512, 1024, min(vmem_phys - (16 << 20), 110 << 20)


def mlp_block(x, gamma, beta, w1, b1, w2, b2, *, tm=None, tn=None):
    """x: (B, S, E) -> (B, S, E).  w1: (E, M), w2: (M, E) (already transposed to (in, out))."""
    B, S, E = x.shape
    M = w1.shape[1]
    T = B * S

    _, tm_def, tn_def, vmem_budget = _chip_defaults()
    tm = tm_def if tm is None else tm
    tn = tn_def if tn is None else tn

    # Clamp tiles to the problem size; keep >= 2 token tiles when there is enough work so the
    # "parallel" token axis load-balances across v7x's two TensorCores.
    tm_eff = min(tm, _round_up(T, 8))
    if tm_eff >= 256 and _round_up(T, tm_eff) // tm_eff < 2:
        tm_eff = max(128, _round_up(pl.cdiv(T, 2), 8))
    tn_eff = min(tn, M)

    # Auto-shrink tiles if the estimate exceeds the usable VMEM budget.
    while _est_vmem_bytes(tm_eff, tn_eff, E) > int(0.8 * vmem_budget):
        if tn_eff > 256:
            tn_eff = max(256, tn_eff // 2)
        elif tm_eff > 128:
            tm_eff = max(128, tm_eff // 2)
        else:
            break

    T_pad = _round_up(T, tm_eff)
    M_pad = _round_up(M, tn_eff)

    # x streamed as bf16 (LN math is done in f32 inside the kernel); output stays f32.
    x2 = x.reshape(T, E).astype(jnp.bfloat16)
    if T_pad != T:
        x2 = jnp.pad(x2, ((0, T_pad - T), (0, 0)))

    # Matmul weights in bf16 (f32 MXU accumulation inside the kernel); LN/bias params stay f32.
    w1b = w1.astype(jnp.bfloat16)
    w2b = w2.astype(jnp.bfloat16)
    b1_2 = b1.reshape(1, M).astype(jnp.float32)
    if M_pad != M:
        w1b = jnp.pad(w1b, ((0, 0), (0, M_pad - M)))
        b1_2 = jnp.pad(b1_2, ((0, 0), (0, M_pad - M)))
        w2b = jnp.pad(w2b, ((0, M_pad - M), (0, 0)))

    gamma2 = gamma.reshape(1, E).astype(jnp.float32)
    beta2 = beta.reshape(1, E).astype(jnp.float32)
    b2_2 = b2.reshape(1, E).astype(jnp.float32)

    grid = (T_pad // tm_eff, M_pad // tn_eff)

    est = _est_vmem_bytes(tm_eff, tn_eff, E)
    vmem_limit = min(vmem_budget, max(int(est * 1.5) + (2 << 20), 32 << 20))

    out = pl.pallas_call(
        mlp_block_kernel,
        out_shape=jax.ShapeDtypeStruct((T_pad, E), jnp.float32),
        grid_spec=pltpu.PrefetchScalarGridSpec(
            num_scalar_prefetch=0,
            grid=grid,
            in_specs=[
                pl.BlockSpec((tm_eff, E), lambda i, k: (i, 0)),   # x tokens (resident across k)
                pl.BlockSpec((1, E), lambda i, k: (0, 0)),        # layernorm gamma
                pl.BlockSpec((1, E), lambda i, k: (0, 0)),        # layernorm beta
                pl.BlockSpec((E, tn_eff), lambda i, k: (0, k)),   # W1 hidden-dim slab
                pl.BlockSpec((1, tn_eff), lambda i, k: (0, k)),   # b1 hidden-dim slab
                pl.BlockSpec((tn_eff, E), lambda i, k: (k, 0)),   # W2 hidden-dim slab
                pl.BlockSpec((1, E), lambda i, k: (0, 0)),        # b2
            ],
            out_specs=pl.BlockSpec((tm_eff, E), lambda i, k: (i, 0)),
            scratch_shapes=[
                pltpu.VMEM((tm_eff, E), jnp.bfloat16),            # normalized x (bf16 operand)
            ],
        ),
        compiler_params=pltpu.CompilerParams(
            dimension_semantics=("parallel", "arbitrary"),
            vmem_limit_bytes=vmem_limit,
        ),
    )(x2, gamma2, beta2, w1b, b1_2, w2b, b2_2)

    return out[:T].reshape(B, S, E).astype(x.dtype)


def reference_mlp_block_f32(x, gamma, beta, w1, b1, w2, b2):
    xf = x.astype(jnp.float32)
    mean = jnp.mean(xf, axis=-1, keepdims=True)
    var = jnp.mean((xf - mean) ** 2, axis=-1, keepdims=True)
    xn = (xf - mean) * lax.rsqrt(var + LN_EPS) * gamma + beta
    h = xn @ w1 + b1
    h = 0.5 * h * (1.0 + lax.erf(h * _INV_SQRT2))
    y = h @ w2 + b2
    return y.astype(x.dtype)


def reference_mlp_block_bf16_matmul(x, gamma, beta, w1, b1, w2, b2):
    # Mirrors the kernel's numerics: bf16 x stream, f32 LN/GELU, bf16 matmuls, f32 accumulation.
    xf = x.astype(jnp.bfloat16).astype(jnp.float32)
    mean = jnp.mean(xf, axis=-1, keepdims=True)
    var = jnp.mean((xf - mean) ** 2, axis=-1, keepdims=True)
    xn = (xf - mean) * lax.rsqrt(var + LN_EPS) * gamma + beta
    h = jnp.dot(xn.astype(jnp.bfloat16), w1.astype(jnp.bfloat16),
                preferred_element_type=jnp.float32) + b1
    h = 0.5 * h * (1.0 + lax.erf(h * _INV_SQRT2))
    y = jnp.dot(h.astype(jnp.bfloat16), w2.astype(jnp.bfloat16),
                preferred_element_type=jnp.float32) + b2
    return y.astype(x.dtype)


if __name__ == "__main__":
    # Small shapes consistent with the module: batch=2, seq=8, embedding=128, mlp=256.
    B, S, E, M = 2, 8, 128, 256
    key = jax.random.PRNGKey(0)
    kx, kg, kb, kw1, kb1, kw2, kb2 = jax.random.split(key, 7)

    x = jax.random.normal(kx, (B, S, E), dtype=jnp.float32)

    # Deterministic synthetic parameters (nn.LayerNorm + two nn.Linear layers).
    gamma = 1.0 + 0.01 * jax.random.normal(kg, (E,), dtype=jnp.float32)
    beta = 0.01 * jax.random.normal(kb, (E,), dtype=jnp.float32)
    # Linear weights stored already transposed to (in, out) for the kernel matmuls.
    w1 = jax.random.normal(kw1, (E, M), dtype=jnp.float32) * (1.0 / math.sqrt(E))
    b1 = jax.random.normal(kb1, (M,), dtype=jnp.float32) * 0.02
    w2 = jax.random.normal(kw2, (M, E), dtype=jnp.float32) * (1.0 / math.sqrt(M))
    b2 = jax.random.normal(kb2, (E,), dtype=jnp.float32) * 0.02

    out = mlp_block(x, gamma, beta, w1, b1, w2, b2)
    out = jax.block_until_ready(out)
    assert out.shape == (B, S, E)

    # Tight check vs a reference with identical (bf16-stream / bf16-matmul / f32-accum) numerics.
    ref_bf16 = reference_mlp_block_bf16_matmul(x, gamma, beta, w1, b1, w2, b2)
    assert jnp.allclose(out, ref_bf16, atol=5e-3, rtol=5e-3), "mismatch vs bf16-matmul reference"

    # Looser check vs the full-f32 PyTorch-equivalent math (bf16 rounding of inputs/operands).
    ref_f32 = reference_mlp_block_f32(x, gamma, beta, w1, b1, w2, b2)
    assert jnp.allclose(out, ref_f32, atol=5e-2, rtol=5e-2), "mismatch vs f32 reference"

    print("KERNEL_OK")
</pallas_src>

<mosaic_0001>
module attributes {stable_mosaic.version = 11 : i64} {
  func.func @mlp_block_kernel(%arg0: i32, %arg1: i32, %arg2: memref<16x128xbf16, #tpu.memory_space<vmem>>, %arg3: memref<1x128xf32, #tpu.memory_space<vmem>>, %arg4: memref<1x128xf32, #tpu.memory_space<vmem>>, %arg5: memref<128x256xbf16, #tpu.memory_space<vmem>>, %arg6: memref<1x256xf32, #tpu.memory_space<vmem>>, %arg7: memref<256x128xbf16, #tpu.memory_space<vmem>>, %arg8: memref<1x128xf32, #tpu.memory_space<vmem>>, %arg9: memref<16x128xf32, #tpu.memory_space<vmem>>, %arg10: memref<16x128xbf16, #tpu.memory_space<vmem>>) attributes {dimension_semantics = [#tpu.dimension_semantics<parallel>, #tpu.dimension_semantics<arbitrary>], iteration_bounds = array<i64: 1, 1>, scalar_prefetch = 0 : i64, scratch_operands = 1 : i64, tpu.core_type = #tpu.core_type<tc>, window_params = [{transform_indices = @transform_0, window_bounds = array<i64: 16, 128>}, {pipeline_mode = #tpu.pipeline_mode<synchronous>, transform_indices = @transform_1, window_bounds = array<i64: 1, 128>}, {pipeline_mode = #tpu.pipeline_mode<synchronous>, transform_indices = @transform_2, window_bounds = array<i64: 1, 128>}, {transform_indices = @transform_3, window_bounds = array<i64: 128, 256>}, {transform_indices = @transform_4, window_bounds = array<i64: 1, 256>}, {transform_indices = @transform_5, window_bounds = array<i64: 256, 128>}, {pipeline_mode = #tpu.pipeline_mode<synchronous>, transform_indices = @transform_6, window_bounds = array<i64: 1, 128>}, {transform_indices = @transform_7, window_bounds = array<i64: 16, 128>}]} {
    %c0_i32 = arith.constant 0 : i32
    %0 = arith.cmpi eq, %arg1, %c0_i32 : i32
    %1 = arith.extui %0 : i1 to i32
    %c0_i32_0 = arith.constant 0 : i32
    %2 = arith.cmpi ne, %1, %c0_i32_0 : i32
    scf.if %2 {
      %c0_18 = arith.constant 0 : index
      %c0_19 = arith.constant 0 : index
      %26 = vector.load %arg2[%c0_18, %c0_19] : memref<16x128xbf16, #tpu.memory_space<vmem>>, vector<16x128xbf16>
      %27 = arith.extf %26 : vector<16x128xbf16> to vector<16x128xf32>
      %cst_20 = arith.constant dense<0.000000e+00> : vector<16xf32>
      %28 = vector.multi_reduction <add>, %27, %cst_20 [1] : vector<16x128xf32> to vector<16xf32>
      %29 = vector.shape_cast %28 : vector<16xf32> to vector<16x1xf32>
      %cst_21 = arith.constant 1.280000e+02 : f32
      %30 = vector.broadcast %cst_21 : f32 to vector<16x1xf32>
      %31 = arith.divf %29, %30 : vector<16x1xf32>
      %32 = vector.broadcast %31 : vector<16x1xf32> to vector<16x128xf32>
      %33 = arith.subf %27, %32 : vector<16x128xf32>
      %34 = arith.mulf %33, %33 : vector<16x128xf32>
      %cst_22 = arith.constant dense<0.000000e+00> : vector<16xf32>
      %35 = vector.multi_reduction <add>, %34, %cst_22 [1] : vector<16x128xf32> to vector<16xf32>
      %36 = vector.shape_cast %35 : vector<16xf32> to vector<16x1xf32>
      %cst_23 = arith.constant 1.280000e+02 : f32
      %37 = vector.broadcast %cst_23 : f32 to vector<16x1xf32>
      %38 = arith.divf %36, %37 : vector<16x1xf32>
      %cst_24 = arith.constant 9.99999974E-6 : f32
      %39 = vector.broadcast %cst_24 : f32 to vector<16x1xf32>
      %40 = arith.addf %38, %39 : vector<16x1xf32>
      %41 = math.rsqrt %40 : vector<16x1xf32>
      %42 = vector.broadcast %41 : vector<16x1xf32> to vector<16x128xf32>
      %43 = arith.mulf %33, %42 : vector<16x128xf32>
      %c0_25 = arith.constant 0 : index
      %c0_26 = arith.constant 0 : index
      %44 = vector.load %arg3[%c0_25, %c0_26] : memref<1x128xf32, #tpu.memory_space<vmem>>, vector<1x128xf32>
      %45 = vector.broadcast %44 : vector<1x128xf32> to vector<16x128xf32>
      %46 = arith.mulf %43, %45 : vector<16x128xf32>
      %c0_27 = arith.constant 0 : index
      %c0_28 = arith.constant 0 : index
      %47 = vector.load %arg4[%c0_27, %c0_28] : memref<1x128xf32, #tpu.memory_space<vmem>>, vector<1x128xf32>
      %48 = vector.broadcast %47 : vector<1x128xf32> to vector<16x128xf32>
      %49 = arith.addf %46, %48 : vector<16x128xf32>
      %50 = arith.truncf %49 : vector<16x128xf32> to vector<16x128xbf16>
      %c0_29 = arith.constant 0 : index
      %c0_30 = arith.constant 0 : index
      %51 = vector.load %arg10[%c0_29, %c0_30] : memref<16x128xbf16, #tpu.memory_space<vmem>>, vector<16x128xbf16>
      tpu.vector_store %arg10[%c0_29, %c0_30], %50 {strides = array<i32>} : memref<16x128xbf16, #tpu.memory_space<vmem>>, vector<16x128xbf16>,
      %cst_31 = arith.constant 0.000000e+00 : f32
      %52 = vector.broadcast %cst_31 : f32 to vector<16x128xf32>
      %c0_32 = arith.constant 0 : index
      %c0_33 = arith.constant 0 : index
      %53 = vector.load %arg9[%c0_32, %c0_33] : memref<16x128xf32, #tpu.memory_space<vmem>>, vector<16x128xf32>
      tpu.vector_store %arg9[%c0_32, %c0_33], %52 {strides = array<i32>} : memref<16x128xf32, #tpu.memory_space<vmem>>, vector<16x128xf32>,
    } else {
    }
    %c0 = arith.constant 0 : index
    %c0_1 = arith.constant 0 : index
    %3 = vector.load %arg10[%c0, %c0_1] : memref<16x128xbf16, #tpu.memory_space<vmem>>, vector<16x128xbf16>
    %c0_2 = arith.constant 0 : index
    %c0_3 = arith.constant 0 : index
    %4 = vector.load %arg5[%c0_2, %c0_3] : memref<128x256xbf16, #tpu.memory_space<vmem>>, vector<128x256xbf16>
    %cst = arith.constant dense<0.000000e+00> : vector<16x256xf32>
    %5 = tpu.matmul %3, %4, %cst {dimension_numbers = #tpu.dot_dimension_numbers<[1], [0], [0], [1], [0, 0, 1, 1], [], []>} : vector<16x128xbf16>, vector<128x256xbf16>, vector<16x256xf32> -> vector<16x256xf32>
    %c0_4 = arith.constant 0 : index
    %c0_5 = arith.constant 0 : index
    %6 = vector.load %arg6[%c0_4, %c0_5] : memref<1x256xf32, #tpu.memory_space<vmem>>, vector<1x256xf32>
    %7 = vector.broadcast %6 : vector<1x256xf32> to vector<16x256xf32>
    %8 = arith.addf %5, %7 : vector<16x256xf32>
    %cst_6 = arith.constant 5.000000e-01 : f32
    %9 = vector.broadcast %cst_6 : f32 to vector<16x256xf32>
    %10 = arith.mulf %9, %8 : vector<16x256xf32>
    %cst_7 = arith.constant 0.707106769 : f32
    %11 = vector.broadcast %cst_7 : f32 to vector<16x256xf32>
    %12 = arith.mulf %8, %11 : vector<16x256xf32>
    %13 = math.erf %12 : vector<16x256xf32>
    %cst_8 = arith.constant 1.000000e+00 : f32
    %14 = vector.broadcast %cst_8 : f32 to vector<16x256xf32>
    %15 = arith.addf %14, %13 : vector<16x256xf32>
    %16 = arith.mulf %10, %15 : vector<16x256xf32>
    %c0_9 = arith.constant 0 : index
    %c0_10 = arith.constant 0 : index
    %17 = vector.load %arg9[%c0_9, %c0_10] : memref<16x128xf32, #tpu.memory_space<vmem>>, vector<16x128xf32>
    %18 = arith.truncf %16 : vector<16x256xf32> to vector<16x256xbf16>
    %c0_11 = arith.constant 0 : index
    %c0_12 = arith.constant 0 : index
    %19 = vector.load %arg7[%c0_11, %c0_12] : memref<256x128xbf16, #tpu.memory_space<vmem>>, vector<256x128xbf16>
    %cst_13 = arith.constant dense<0.000000e+00> : vector<16x128xf32>
    %20 = tpu.matmul %18, %19, %cst_13 {dimension_numbers = #tpu.dot_dimension_numbers<[1], [0], [0], [1], [0, 0, 1, 1], [], []>} : vector<16x256xbf16>, vector<256x128xbf16>, vector<16x128xf32> -> vector<16x128xf32>
    %21 = arith.addf %17, %20 : vector<16x128xf32>
    %c0_14 = arith.constant 0 : index
    %c0_15 = arith.constant 0 : index
    %22 = vector.load %arg9[%c0_14, %c0_15] : memref<16x128xf32, #tpu.memory_space<vmem>>, vector<16x128xf32>
    tpu.vector_store %arg9[%c0_14, %c0_15], %21 {strides = array<i32>} : memref<16x128xf32, #tpu.memory_space<vmem>>, vector<16x128xf32>,
    %c0_i32_16 = arith.constant 0 : i32
    %23 = arith.cmpi eq, %arg1, %c0_i32_16 : i32
    %24 = arith.extui %23 : i1 to i32
    %c0_i32_17 = arith.constant 0 : i32
    %25 = arith.cmpi ne, %24, %c0_i32_17 : i32
    scf.if %25 {
      %c0_18 = arith.constant 0 : index
      %c0_19 = arith.constant 0 : index
      %26 = vector.load %arg9[%c0_18, %c0_19] : memref<16x128xf32, #tpu.memory_space<vmem>>, vector<16x128xf32>
      %c0_20 = arith.constant 0 : index
      %c0_21 = arith.constant 0 : index
      %27 = vector.load %arg8[%c0_20, %c0_21] : memref<1x128xf32, #tpu.memory_space<vmem>>, vector<1x128xf32>
      %28 = vector.broadcast %27 : vector<1x128xf32> to vector<16x128xf32>
      %29 = arith.addf %26, %28 : vector<16x128xf32>
      %c0_22 = arith.constant 0 : index
      %c0_23 = arith.constant 0 : index
      %30 = vector.load %arg9[%c0_22, %c0_23] : memref<16x128xf32, #tpu.memory_space<vmem>>, vector<16x128xf32>
      tpu.vector_store %arg9[%c0_22, %c0_23], %29 {strides = array<i32>} : memref<16x128xf32, #tpu.memory_space<vmem>>, vector<16x128xf32>,
    } else {
    }
    return
  }
  func.func @transform_0(%arg0: i32, %arg1: i32) -> (i32, i32) {
    %c0_i32 = arith.constant 0 : i32
    %c0_i32_0 = arith.constant 0 : i32
    return %arg0, %c0_i32 : i32, i32
  }
  func.func @transform_1(%arg0: i32, %arg1: i32) -> (i32, i32) {
    %c0_i32 = arith.constant 0 : i32
    %c0_i32_0 = arith.constant 0 : i32
    %c0_i32_1 = arith.constant 0 : i32
    return %c0_i32, %c0_i32_0 : i32, i32
  }
  func.func @transform_2(%arg0: i32, %arg1: i32) -> (i32, i32) {
    %c0_i32 = arith.constant 0 : i32
    %c0_i32_0 = arith.constant 0 : i32
    %c0_i32_1 = arith.constant 0 : i32
    return %c0_i32, %c0_i32_0 : i32, i32
  }
  func.func @transform_3(%arg0: i32, %arg1: i32) -> (i32, i32) {
    %c0_i32 = arith.constant 0 : i32
    %c0_i32_0 = arith.constant 0 : i32
    return %c0_i32, %arg1 : i32, i32
  }
  func.func @transform_4(%arg0: i32, %arg1: i32) -> (i32, i32) {
    %c0_i32 = arith.constant 0 : i32
    %c0_i32_0 = arith.constant 0 : i32
    return %c0_i32, %arg1 : i32, i32
  }
  func.func @transform_5(%arg0: i32, %arg1: i32) -> (i32, i32) {
    %c0_i32 = arith.constant 0 : i32
    %c0_i32_0 = arith.constant 0 : i32
    return %arg1, %c0_i32 : i32, i32
  }
  func.func @transform_6(%arg0: i32, %arg1: i32) -> (i32, i32) {
    %c0_i32 = arith.constant 0 : i32
    %c0_i32_0 = arith.constant 0 : i32
    %c0_i32_1 = arith.constant 0 : i32
    return %c0_i32, %c0_i32_0 : i32, i32
  }
  func.func @transform_7(%arg0: i32, %arg1: i32) -> (i32, i32) {
    %c0_i32 = arith.constant 0 : i32
    %c0_i32_0 = arith.constant 0 : i32
    return %arg0, %c0_i32 : i32, i32
  }
}

</mosaic_0001>

<bundles_post_ra>
// kernel: tpu_custom_call.1
= control target key start
LH: loop header
LB: loop body
LE: loop exit
PB: predicated region body
PF: predicated region fallthrough
CT: control target
= control target key end

     0   :  { %12 = vsyncpa [#allocation4], 0  ;;  %s1214_s0 = inlined_call_operand.hbm [shape: bf16[16,128], index: 0, kind: input, shape index: {}]   ;;  %s1215_s1 = inlined_call_operand.hbm [shape: f32[1,128], index: 1, kind: input, shape index: {}]   ;;  %s1216_s2 = inlined_call_operand.vmem [shape: f32[1,128], index: 2, kind: input, shape index: {}]   ;;  %s1217_s3 = inlined_call_operand.hbm [shape: bf16[128,256], index: 3, kind: input, shape index: {}]   ;;  %s1218_s4 = inlined_call_operand.vmem [shape: f32[1,256], index: 4, kind: input, shape index: {}]   ;;  %s1219_s5 = inlined_call_operand.hbm [shape: bf16[256,128], index: 5, kind: input, shape index: {}]   ;;  %s1220_s6 = inlined_call_operand.vmem [shape: f32[1,128], index: 6, kind: input, shape index: {}]   ;;  %s1221_s7 = inlined_call_operand.hbm [shape: f32[16,128], index: 7, kind: output, shape index: {}]  }
   0x1   :  { %13 = vsyncpa [#allocation7], 0 }
   0x2   :  { %14 = vsyncpa [#allocation10], 0  ;;  %s34_s26 = sshll.u32 %s1215_s1, 4  ;;  %s35_s26 = int_to_ptr.hbm [resolvable:$true] %s34_s26 }
   0x3   :  { %15 = vsyncpa [#allocation5], 0  ;;  %s1007_s27 = smov [#allocation6]   ;;  %s20_s8 = sshll.u32 %s1214_s0, 4  ;;  %s21_s8 = int_to_ptr.hbm [resolvable:$true] %s20_s8 }
   0x4   :  { %s36_s28 = sshll.u32 %s1007_s27, 4  ;;  %s1008_s9 = smov [#allocation3]   ;;  %s37_s28 = int_to_ptr.vmem [resolvable:$true] %s36_s28 }
   0x5   :  { %39 = dma.hbm_to_vmem [thread:$0]  %s35_s26, 16, %s37_s28, [#allocation7]  }
   0x6   :  { %s22_s10 = sshll.u32 %s1008_s9, 4  ;;  %s1009_s11 = smov 64   ;;  %s23_s10 = int_to_ptr.vmem [resolvable:$true] %s22_s10 }
   0x7   :  { %s1010_s12 = smov 4   ;;  %s46_s1 = sshll.u32 %s1217_s3, 4  ;;  %s47_s1 = int_to_ptr.hbm [resolvable:$true] %s46_s1 }
   0x8   :  { %28 = dma.hbm_to_vmem [thread:$0]  %s21_s8, 128, %s23_s10, [#allocation4], %s1009_s11, %s1009_s11, %s1010_s12  }
   0x9   :  { %s1011_s15 = smov [#allocation8]   ;;  %s61_s0 = sshll.u32 %s1219_s5, 4  ;;  %s62_s0 = int_to_ptr.hbm [resolvable:$true] %s61_s0 }
   0xa   :  { %s48_s16 = sshll.u32 %s1011_s15, 4  ;;  %s1012_s19 = smov 128   ;;  %s49_s16 = int_to_ptr.vmem [resolvable:$true] %s48_s16 }
   0xb   :  { %s1013_s20 = smov 8   ;;  %s1014_s21 = smov [#allocation9]  }
   0xc   :  { %54 = dma.hbm_to_vmem [thread:$0]  %s47_s1, 2048, %s49_s16, [#allocation7], %s1012_s19, %s1012_s19, %s1013_s20  }
   0xd   :  { %s63_s22 = sshll.u32 %s1014_s21, 4  ;;  %s64_s22 = int_to_ptr.vmem [resolvable:$true] %s63_s22 }
   0xe   :  { %69 = dma.hbm_to_vmem [thread:$0]  %s62_s0, 2048, %s64_s22, [#allocation10], %s1009_s11, %s1009_s11, %s1010_s12  }
   0xf   :  { %999 = dma.done.wait [#allocation4], 128  }
  0x10   :  { %1000 = vsyncadd [#allocation4], 4294967168 }
  0x11   :  { %1001 = dma.done.wait [#allocation7], 2064  }
  0x12   :  { %1002 = vsyncadd [#allocation7], 4294965232 }
  0x13   :  { %1003 = dma.done.wait [#allocation10], 2048  }
  0x14   :  { %1004 = vsyncadd [#allocation10], 4294965248  ;;  %v843_v0 = vld [vmem:[#allocation3] sm:$0xff]   ;;  %v1015_v3 = vmov 128.0   ;;  %v735_v18 = vld [vmem:[#allocation8 + $0x70] sm:$0xf] }
  0x15   :  { %v844_v1 = vunpack.c.l.bf16 %v843_v0  ;;  %v845_v2 = vunpack.c.h.bf16 %v843_v0  ;;  %865 = vrcp.f32 %v1015_v3  ;;  %v825_v19 = vld [vmem:[#allocation8 + $0x74] sm:$0xf0]  ;;  %v824_v20 = vld [vmem:[#allocation8 + $0x74] sm:$0xf]  ;;  %v737_v22 = vld [vmem:[#allocation8 + $0x78] sm:$0xf0] }
  0x16   :  { %v736_v21 = vor.u32 %v825_v19, %v735_v18  ;;  %v740_v23 = vor.u32 %v824_v20, %v737_v22  ;;  %v727_v24 = vld [vmem:[#allocation8 + $0x60] sm:$0xf]  ;;  %v823_v25 = vld [vmem:[#allocation8 + $0x64] sm:$0xf0]  ;;  %v822_v26 = vld [vmem:[#allocation8 + $0x64] sm:$0xf] }
  0x17   :  { %96 = vadd.xlane.f32.xlu0 %v844_v1  ;;  %v728_v27 = vor.u32 %v823_v25, %v727_v24  ;;  %v729_v28 = vld [vmem:[#allocation8 + $0x68] sm:$0xf0]  ;;  %v719_v30 = vld [vmem:[#allocation8 + $0x50] sm:$0xf]  ;;  %v821_v31 = vld [vmem:[#allocation8 + $0x54] sm:$0xf0] }
  0x18   :  { %271 = vmatpush.bf16.msra.mxu0 %v736_v21  ;;  %285 = vmatpush.bf16.msra.mxu1 %v740_v23  ;;  %v732_v29 = vor.u32 %v822_v26, %v729_v28  ;;  %v820_v32 = vld [vmem:[#allocation8 + $0x54] sm:$0xf]  ;;  %v720_v33 = vor.u32 %v821_v31, %v719_v30  ;;  %v721_v34 = vld [vmem:[#allocation8 + $0x58] sm:$0xf0]  ;;  %v711_v36 = vld [vmem:[#allocation8 + $0x40] sm:$0xf] }
  0x19   :  { %v724_v35 = vor.u32 %v820_v32, %v721_v34  ;;  %v819_v37 = vld [vmem:[#allocation8 + $0x44] sm:$0xf0]  ;;  %v818_v38 = vld [vmem:[#allocation8 + $0x44] sm:$0xf]  ;;  %v713_v40 = vld [vmem:[#allocation8 + $0x48] sm:$0xf0] }
  0x1a   :  { %v712_v39 = vor.u32 %v819_v37, %v711_v36  ;;  %v716_v41 = vor.u32 %v818_v38, %v713_v40  ;;  %v703_v42 = vld [vmem:[#allocation8 + $0x30] sm:$0xf]  ;;  %v817_v43 = vld [vmem:[#allocation8 + $0x34] sm:$0xf0]  ;;  %v816_v44 = vld [vmem:[#allocation8 + $0x34] sm:$0xf] }
  0x1b   :  { %v866_v4 = vpop.eup %865  ;;  %v704_v45 = vor.u32 %v817_v43, %v703_v42  ;;  %v705_v46 = vld [vmem:[#allocation8 + $0x38] sm:$0xf0]  ;;  %v695_v50 = vld [vmem:[#allocation8 + $0x20] sm:$0xf]  ;;  %v815_v51 = vld [vmem:[#allocation8 + $0x24] sm:$0xf0] }
  0x1c   :  { %v101_v5 = vmul.f32 128.0, %v866_v4  ;;  %vm105_vm0 = vweird.f32 %v866_v4  ;;  %272 = vmatpush.bf16.msra.mxu0 %v728_v27  ;;  %286 = vmatpush.bf16.msra.mxu1 %v732_v29  ;;  %v708_v48 = vor.u32 %v816_v44, %v705_v46  ;;  %v814_v52 = vld [vmem:[#allocation8 + $0x24] sm:$0xf]  ;;  %v696_v54 = vor.u32 %v815_v51, %v695_v50  ;;  %v697_v55 = vld [vmem:[#allocation8 + $0x28] sm:$0xf0]  ;;  %v833_v38 = vld [vmem:[#allocation9 + $0x38] sm:$0xff] }
  0x1d   :  { %v700_v56 = vor.u32 %v814_v52, %v697_v55  ;;  %v687_v57 = vld [vmem:[#allocation8 + $0x10] sm:$0xf]  ;;  %v813_v58 = vld [vmem:[#allocation8 + $0x14] sm:$0xf0]  ;;  %v812_v59 = vld [vmem:[#allocation8 + $0x14] sm:$0xf]  ;;  %607 = vmatpush.bf16.msra.mxu2 %v833_v38 }
  0x1e   :  { %v102_v6 = vsub.f32 1.0, %v101_v5  ;;  %v688_v60 = vor.u32 %v813_v58, %v687_v57  ;;  %v689_v61 = vld [vmem:[#allocation8 + $0x18] sm:$0xf0]  ;;  %v679_v62 = vld [vmem:[#allocation8] sm:$0xf]  ;;  %v832_v43 = vld [vmem:[#allocation9 + $0x30] sm:$0xff] }
  0x1f   :  { %98 = vadd.xlane.f32.xlu0 %v845_v2  ;;  %v811_v63 = vld [vmem:[#allocation8 + $0x4] sm:$0xf0]  ;;  %v681_v3 = vld [vmem:[#allocation8 + $0x8] sm:$0xf0]  ;;  %v862_v22 = vld [vmem:[#allocation6] ss:$0 sm:$0xff] }
  0x20   :  { %v103_v7 = vmul.f32 %v866_v4, %v102_v6  ;;  %273 = vmatpush.bf16.msra.mxu0 %v720_v33  ;;  %287 = vmatpush.bf16.msra.mxu1 %v724_v35  ;;  %v680_v5 = vor.u32 %v811_v63, %v679_v62  ;;  %v863_v26 = vld [vmem:[%s1216_s2] ss:$0 sm:$0xff]  ;;  %v840_v44 = vld [vmem:[#allocation9 + $0x70] sm:$0xff]  ;;  %v838_v57 = vld [vmem:[#allocation9 + $0x60] sm:$0xff]  ;;  %s1016_s25 = smov [#allocation11]   ;;  %s658_s29 = sshll.u32 %s1221_s7, 4  ;;  %s659_s29 = int_to_ptr.hbm [resolvable:$true] %s658_s29 }
  0x21   :  { %608 = vmatpush.bf16.msra.mxu2 %v832_v43  ;;  %v826_v38 = vld [vmem:[#allocation9] sm:$0xff]  ;;  %s656_s26 = sshll.u32 %s1016_s25, 4  ;;  %s657_s26 = int_to_ptr.vmem [resolvable:$true] %s656_s26 }
  0x22   :  { %v104_v8 = vadd.f32 %v866_v4, %v103_v7 }
  0x24   :  { %v1072_v9 = vsel %vm105_vm0, %v866_v4, %v104_v8  ;;  %274 = vmatpush.bf16.msra.mxu0 %v712_v39  ;;  %288 = vmatpush.bf16.msra.mxu1 %v716_v41  ;;  %v841_v39 = vld [vmem:[#allocation9 + $0x78] sm:$0xff] }
  0x25   :  { %621 = vmatpush.bf16.msra.mxu3 %v841_v39  ;;  %v834_v39 = vld [vmem:[#allocation9 + $0x40] sm:$0xff] }
  0x28   :  { %275 = vmatpush.bf16.msra.mxu0 %v704_v45  ;;  %289 = vmatpush.bf16.msra.mxu1 %v708_v48  ;;  %v839_v48 = vld [vmem:[#allocation9 + $0x68] sm:$0xff] }
  0x29   :  { %622 = vmatpush.bf16.msra.mxu3 %v840_v44 }
  0x2c   :  { %276 = vmatpush.bf16.msra.mxu0 %v696_v54  ;;  %290 = vmatpush.bf16.msra.mxu1 %v700_v56  ;;  %v830_v56 = vld [vmem:[#allocation9 + $0x20] sm:$0xff] }
  0x2d   :  { %623 = vmatpush.bf16.msra.mxu3 %v839_v48 }
  0x30   :  { %277 = vmatpush.bf16.msra.mxu0 %v688_v60 }
  0x31   :  { %624 = vmatpush.bf16.msra.mxu3 %v838_v57 }
  0x34   :  { %278 = vmatpush.bf16.msra.mxu0 %v680_v5  ;;  %v829_v5 = vld [vmem:[#allocation9 + $0x18] sm:$0xff] }
  0x8a   :  { %v97_v10 = vpop.xlane.xlu0 %96 }
  0x8b   :  { %v107_v11 = vmul.f32 %v1072_v9, %v97_v10 }
  0x8d   :  { %v1075_v12 = vsub.f32 %v844_v1, %v107_v11  ;;  %v692_v1 = vor.u32 %v812_v59, %v689_v61 }
  0x8f   :  { %v111_v13 = vmul.f32 %v1075_v12, %v1075_v12  ;;  %291 = vmatpush.bf16.msra.mxu1 %v692_v1 }
  0x91   :  { %113 = vadd.xlane.f32.xlu1 %v111_v13 }
  0x92   :  { %v99_v14 = vpop.xlane.xlu0 %98 }
  0x93   :  { %v108_v15 = vmul.f32 %v1072_v9, %v99_v14 }
  0x95   :  { %v1080_v16 = vsub.f32 %v845_v2, %v108_v15  ;;  %v810_v2 = vld [vmem:[#allocation8 + $0x4] sm:$0xf] }
  0x96   :  { %v684_v6 = vor.u32 %v810_v2, %v681_v3 }
  0x97   :  { %v112_v17 = vmul.f32 %v1080_v16, %v1080_v16 }
  0x98   :  { %292 = vmatpush.bf16.msra.mxu1 %v684_v6  ;;  %v837_v6 = vld [vmem:[#allocation9 + $0x58] sm:$0xff] }
  0x99   :  { %115 = vadd.xlane.f32.xlu1 %v112_v17  ;;  %625 = vmatpush.bf16.msra.mxu3 %v837_v6 }
 0x104   :  { %v114_v47 = vpop.xlane.xlu1 %113 }
 0x105   :  { %v117_v49 = vmul.f32 %v114_v47, %v1072_v9  ;;  %v831_v47 = vld [vmem:[#allocation9 + $0x28] sm:$0xff] }
 0x106   :  { %609 = vmatpush.bf16.msra.mxu2 %v831_v47 }
 0x107   :  { %v119_v53 = vadd.f32 1e-05, %v117_v49 }
 0x109   :  { %867 = vrsqrt.f32 %v119_v53  ;;  %vm127_vm2 = vweird.f32 %v119_v53 }
 0x10a   :  { %610 = vmatpush.bf16.msra.mxu2 %v830_v56 }
 0x10c   :  { %v116_v0 = vpop.xlane.xlu1 %115 }
 0x10d   :  { %v118_v4 = vmul.f32 %v116_v0, %v1072_v9 }
 0x10e   :  { %611 = vmatpush.bf16.msra.mxu2 %v829_v5 }
 0x10f   :  { %v868_v7 = vpop.eup %867  ;;  %v120_v8 = vadd.f32 1e-05, %v118_v4 }
 0x110   :  { %v122_v10 = vmul.f32 %v868_v7, %v119_v53  ;;  %vm128_vm1 = vweird.f32 %v868_v7 }
 0x111   :  { %869 = vrsqrt.f32 %v120_v8  ;;  %vm129_vm3 = vmor %vm127_vm2, %vm128_vm1  ;;  %vm137_vm5 = vweird.f32 %v120_v8 }
 0x112   :  { %v123_v11 = vmul.f32 %v868_v7, %v122_v10 }
 0x114   :  { %v124_v13 = vmul.f32 0.5, %v123_v11 }
 0x116   :  { %v125_v14 = vsub.f32 1.5, %v124_v13 }
 0x117   :  { %v870_v15 = vpop.eup %869 }
 0x118   :  { %v126_v17 = vmul.f32 %v868_v7, %v125_v14  ;;  %v132_v18 = vmul.f32 %v870_v15, %v120_v8  ;;  %vm138_vm4 = vweird.f32 %v870_v15 }
 0x119   :  { %vm139_vm6 = vmor %vm137_vm5, %vm138_vm4 }
 0x11a   :  { %v133_v19 = vmul.f32 %v870_v15, %v132_v18  ;;  %v130_v9 = vsel %vm129_vm3, %v868_v7, %v126_v17  ;;  %v836_v17 = vld [vmem:[#allocation9 + $0x50] sm:$0xff] }
 0x11b   :  { %v141_v23 = vmul.f32 %v130_v9, %v1075_v12  ;;  %v179_v12 = vld [vmem:[%s1218_s4] sm:$0x3]  ;;  %626 = vmatpush.bf16.msra.mxu3 %v836_v17 }
 0x11c   :  { %v134_v20 = vmul.f32 0.5, %v133_v19  ;;  %v181_v34 = vperm.slane %v179_v12, 0  ;;  %v182_v35 = vperm.slane %v179_v12, 1 }
 0x11d   :  { %v147_v27 = vmul.f32 %v862_v22, %v141_v23 }
 0x11e   :  { %v135_v21 = vsub.f32 1.5, %v134_v20 }
 0x11f   :  { %v153_v30 = vadd.f32 %v863_v26, %v147_v27 }
 0x120   :  { %v136_v24 = vmul.f32 %v870_v15, %v135_v21 }
 0x122   :  { %v140_v25 = vsel %vm139_vm6, %v870_v15, %v136_v24  ;;  %v828_v15 = vld [vmem:[#allocation9 + $0x10] sm:$0xff] }
 0x123   :  { %v142_v28 = vmul.f32 %v140_v25, %v1080_v16  ;;  %612 = vmatpush.bf16.msra.mxu2 %v828_v15 }
 0x125   :  { %v148_v29 = vmul.f32 %v862_v22, %v142_v28 }
 0x127   :  { %v154_v31 = vadd.f32 %v863_v26, %v148_v29 }
 0x129   :  { %v849_v32 = vpack.c.bf16 %v154_v31, %v153_v30 }
 0x12b   :  { %850 = vst [vmem:[#allocation2] sm:$0xff] %v849_v32   ;;  %v827_v32 = vld [vmem:[#allocation9 + $0x8] sm:$0xff] }
 0x12c   :  { %613 = vmatpush.bf16.msra.mxu2 %v827_v32 }
 0x130   :  { %614 = vmatpush.bf16.msra.mxu2 %v826_v38 }
 0x132   :  { %v809_v33 = vld [vmem:[#allocation2] sm:$0xff] }
 0x133   :  { %279 = vmatmul.bf16.vlgmr.msra.gmra.mxu0 %v809_v33  ;;  %293 = vmatmul.bf16.vlgmr.msra.gmra.mxu1 %v809_v33  ;;  %v835_v33 = vld [vmem:[#allocation9 + $0x48] sm:$0xff] }
 0x134   :  { %627 = vmatpush.bf16.msra.mxu3 %v835_v33 }
 0x138   :  { %628 = vmatpush.bf16.msra.mxu3 %v834_v39 }
 0x1b0   :  { %v280_v36 = vpop.f32.mrf.mxu0  ;;  %v294_v37 = vpop.f32.mrf.mxu1 }
 0x1b1   :  { %v1094_v40 = vadd.f32 %v280_v36, %v181_v34  ;;  %v1096_v16 = vadd.f32 %v294_v37, %v182_v35 }
 0x1b3   :  { %v1099_v41 = vmul.f32 0.70710677, %v1094_v40  ;;  %v1102_v42 = vmul.f32 0.70710677, %v1096_v16 }
 0x1b5   :  { %v307_v45 = vmul.f32 %v1099_v41, %v1099_v41  ;;  %v347_v46 = vmul.f32 %v1102_v42, %v1102_v42 }
 0x1b7   :  { %v1108_v49 = vmin.f32 %v307_v45, 16.0  ;;  %v1110_v50 = vmin.f32 %v347_v46, 16.0 }
 0x1b8   :  { %v282_v51 = vpop.f32.mrf.mxu0  ;;  %v296_v52 = vpop.f32.mrf.mxu1 }
 0x1b9   :  { %v309_v53 = vmul.f32 2.1237322e-06, %v1108_v49  ;;  %v1113_v54 = vadd.f32 %v282_v51, %v181_v34  ;;  %v1115_v55 = vadd.f32 %v296_v52, %v182_v35  ;;  %v320_v58 = vmul.f32 3.8918573e-05, %v1108_v49 }
 0x1ba   :  { %v360_v59 = vmul.f32 3.8918573e-05, %v1110_v50  ;;  %v349_v1 = vmul.f32 2.1237322e-06, %v1110_v50 }
 0x1bb   :  { %v310_v60 = vadd.f32 0.00028619796, %v309_v53  ;;  %v1120_v61 = vmul.f32 0.70710677, %v1113_v54  ;;  %v1123_v62 = vmul.f32 0.70710677, %v1115_v55 }
 0x1bc   :  { %v321_v63 = vadd.f32 0.001143296, %v320_v58  ;;  %v361_v2 = vadd.f32 0.001143296, %v360_v59  ;;  %v350_v14 = vadd.f32 0.00028619796, %v349_v1 }
 0x1bd   :  { %v311_v0 = vmul.f32 %v310_v60, %v1108_v49  ;;  %v387_v3 = vmul.f32 %v1120_v61, %v1120_v61  ;;  %v427_v4 = vmul.f32 %v1123_v62, %v1123_v62 }
 0x1be   :  { %v322_v7 = vmul.f32 %v321_v63, %v1108_v49  ;;  %v362_v8 = vmul.f32 %v361_v2, %v1110_v50  ;;  %v351_v27 = vmul.f32 %v350_v14, %v1110_v50 }
 0x1bf   :  { %v1133_v10 = vmin.f32 %v387_v3, 16.0  ;;  %v1135_v11 = vmin.f32 %v427_v4, 16.0  ;;  %v312_v19 = vadd.f32 0.0036580483, %v311_v0 }
 0x1c0   :  { %v323_v13 = vadd.f32 0.014752088, %v322_v7  ;;  %v363_v18 = vadd.f32 0.014752088, %v362_v8  ;;  %v352_v51 = vadd.f32 0.0036580483, %v351_v27 }
 0x1c1   :  { %v389_v9 = vmul.f32 2.1237322e-06, %v1133_v10  ;;  %v400_v21 = vmul.f32 3.8918573e-05, %v1133_v10  ;;  %v440_v23 = vmul.f32 3.8918573e-05, %v1135_v11  ;;  %v313_v30 = vmul.f32 %v312_v19, %v1108_v49 }
 0x1c2   :  { %v324_v20 = vmul.f32 %v323_v13, %v1108_v49  ;;  %v364_v22 = vmul.f32 %v363_v18, %v1110_v50  ;;  %v429_v25 = vmul.f32 2.1237322e-06, %v1135_v11  ;;  %v353_v2 = vmul.f32 %v352_v51, %v1110_v50 }
 0x1c3   :  { %v390_v24 = vadd.f32 0.00028619796, %v389_v9  ;;  %v401_v28 = vadd.f32 0.001143296, %v400_v21  ;;  %v441_v34 = vadd.f32 0.001143296, %v440_v23 }
 0x1c4   :  { %v325_v26 = vadd.f32 0.112945676, %v324_v20  ;;  %v365_v29 = vadd.f32 0.112945676, %v364_v22  ;;  %v430_v37 = vadd.f32 0.00028619796, %v429_v25 }
 0x1c5   :  { %v391_v31 = vmul.f32 %v390_v24, %v1133_v10  ;;  %v402_v35 = vmul.f32 %v401_v28, %v1133_v10  ;;  %v442_v44 = vmul.f32 %v441_v34, %v1135_v11  ;;  %v314_v48 = vadd.f32 0.05243302, %v313_v30 }
 0x1c6   :  { %v326_v12 = vmul.f32 %v325_v26, %v1108_v49  ;;  %v366_v36 = vmul.f32 %v365_v29, %v1110_v50  ;;  %v431_v58 = vmul.f32 %v430_v37, %v1135_v11  ;;  %v354_v13 = vadd.f32 0.05243302, %v353_v2 }
 0x1c7   :  { %v392_v45 = vadd.f32 0.0036580483, %v391_v31  ;;  %v403_v46 = vadd.f32 0.014752088, %v402_v35  ;;  %v443_v53 = vadd.f32 0.014752088, %v442_v44  ;;  %v315_v1 = vmul.f32 %v314_v48, %v1108_v49 }
 0x1c8   :  { %v327_v43 = vadd.f32 0.4994258, %v326_v12  ;;  %v367_v47 = vadd.f32 0.4994258, %v366_v36  ;;  %v432_v5 = vadd.f32 0.0036580483, %v431_v58  ;;  %v355_v24 = vmul.f32 %v354_v13, %v1110_v50 }
 0x1c9   :  { %v404_v56 = vmul.f32 %v403_v46, %v1133_v10  ;;  %v393_v60 = vmul.f32 %v392_v45, %v1133_v10  ;;  %v444_v3 = vmul.f32 %v443_v53, %v1135_v11  ;;  %v316_v8 = vadd.f32 0.18741608, %v315_v1 }
 0x1ca   :  { %v328_v52 = vmul.f32 %v327_v43, %v1108_v49  ;;  %v368_v57 = vmul.f32 %v367_v47, %v1110_v50  ;;  %v433_v18 = vmul.f32 %v432_v5, %v1135_v11  ;;  %v356_v12 = vadd.f32 0.18741608, %v355_v24 }
 0x1cb   :  { %v405_v63 = vadd.f32 0.112945676, %v404_v56  ;;  %v394_v6 = vadd.f32 0.05243302, %v393_v60  ;;  %v445_v14 = vadd.f32 0.112945676, %v444_v3  ;;  %v317_v23 = vmul.f32 %v316_v8, %v1108_v49 }
 0x1cc   :  { %v329_v59 = vadd.f32 1.0, %v328_v52  ;;  %v1155_v0 = vadd.f32 1.0, %v368_v57  ;;  %v434_v27 = vadd.f32 0.05243302, %v433_v18  ;;  %v357_v47 = vmul.f32 %v356_v12, %v1110_v50 }
 0x1cd   :  { %v406_v4 = vmul.f32 %v405_v63, %v1133_v10  ;;  %v446_v19 = vmul.f32 %v445_v14, %v1135_v11  ;;  %v395_v20 = vmul.f32 %v394_v6, %v1133_v10  ;;  %v318_v33 = vadd.f32 1.1283791, %v317_v23 }
 0x1ce   :  { %871 = vrcp.f32 %v329_v59  ;;  %v341_v32 = vand.u32 2147483648, %v329_v59  ;;  %v339_v34 = vand.u32 2147483647, %v329_v59  ;;  %vm335_vm8 = vweird.f32 %v329_v59 }
 0x1cf   :  { %873 = vrcp.f32 %v1155_v0  ;;  %v407_v7 = vadd.f32 0.4994258, %v406_v4  ;;  %v447_v29 = vadd.f32 0.4994258, %v446_v19  ;;  %v396_v30 = vadd.f32 0.18741608, %v395_v20 }
 0x1d0   :  { %v435_v37 = vmul.f32 %v434_v27, %v1135_v11  ;;  %v342_v45 = vor.u32 1.1754944e-38, %v341_v32  ;;  %v319_v46 = vmul.f32 %v318_v33, %v1099_v41  ;;  %vm340_vm10 = vcmp.eq.f32.partialorder %v339_v34, 8.507059e+37 }
 0x1d1   :  { %v408_v15 = vmul.f32 %v407_v7, %v1133_v10  ;;  %v448_v35 = vmul.f32 %v447_v29, %v1135_v11  ;;  %v397_v43 = vmul.f32 %v396_v30, %v1133_v10  ;;  %v379_v57 = vand.u32 2147483647, %v1155_v0 }
 0x1d2   :  { %v436_v53 = vadd.f32 0.18741608, %v435_v37  ;;  %v381_v10 = vand.u32 2147483648, %v1155_v0  ;;  %vm375_vm12 = vweird.f32 %v1155_v0  ;;  %v358_v1 = vadd.f32 1.1283791, %v357_v47 }
 0x1d3   :  { %v409_v22 = vadd.f32 1.0, %v408_v15  ;;  %v1175_v38 = vadd.f32 1.0, %v448_v35  ;;  %v398_v58 = vadd.f32 1.1283791, %v397_v43  ;;  %vm380_vm2 = vcmp.eq.f32.partialorder %v379_v57, 8.507059e+37 }
 0x1d4   :  { %v872_v17 = vpop.eup %871  ;;  %v437_v3 = vmul.f32 %v436_v53, %v1135_v11  ;;  %v382_v5 = vor.u32 1.1754944e-38, %v381_v10 }
 0x1d5   :  { %v1165_v9 = vpop.eup %873  ;;  %v331_v21 = vmul.f32 %v872_v17, %v329_v59  ;;  %875 = vrcp.f32 %v409_v22  ;;  %vm336_vm7 = vweird.f32 %v872_v17  ;;  %v419_v59 = vand.u32 2147483647, %v409_v22 }
 0x1d6   :  { %v371_v25 = vmul.f32 %v1165_v9, %v1155_v0  ;;  %vm337_vm9 = vmor %vm335_vm8, %vm336_vm7  ;;  %vm376_vm11 = vweird.f32 %v1165_v9  ;;  %877 = vrcp.f32 %v1175_v38  ;;  %v421_v41 = vand.u32 2147483648, %v409_v22 }
 0x1d7   :  { %v332_v26 = vsub.f32 1.0, %v331_v21  ;;  %vm1186_vm14 = vmor %vm375_vm12, %vm376_vm11  ;;  %vm415_vm15 = vweird.f32 %v409_v22  ;;  %v399_v0 = vmul.f32 %v398_v58, %v1120_v61  ;;  %vm420_vm1 = vcmp.eq.f32.partialorder %v419_v59, 8.507059e+37 }
 0x1d8   :  { %v372_v28 = vsub.f32 1.0, %v371_v25  ;;  %v422_v7 = vor.u32 1.1754944e-38, %v421_v41  ;;  %v459_v21 = vand.u32 2147483647, %v1175_v38  ;;  %v461_v61 = vand.u32 2147483648, %v1175_v38 }
 0x1d9   :  { %v333_v31 = vmul.f32 %v872_v17, %v332_v26  ;;  %v299_v25 = vmul.f32 0.5, %v1094_v40  ;;  %v301_v26 = vmul.f32 0.5, %v1113_v54  ;;  %vm455_vm4 = vweird.f32 %v1175_v38 }
 0x1da   :  { %v373_v36 = vmul.f32 %v1165_v9, %v372_v28  ;;  %v462_v30 = vor.u32 1.1754944e-38, %v461_v61  ;;  %vm460_vm6 = vcmp.eq.f32.partialorder %v459_v21, 8.507059e+37  ;;  %v300_v54 = vmul.f32 0.5, %v1096_v16 }
 0x1db   :  { %v334_v49 = vadd.f32 %v872_v17, %v333_v31  ;;  %v876_v39 = vpop.eup %875 }
 0x1dc   :  { %v411_v48 = vmul.f32 %v876_v39, %v409_v22  ;;  %v374_v52 = vadd.f32 %v1165_v9, %v373_v36  ;;  %vm416_vm13 = vweird.f32 %v876_v39  ;;  %v878_v6 = vpop.eup %877  ;;  %v302_v36 = vmul.f32 0.5, %v1115_v55 }
 0x1dd   :  { %v338_v44 = vsel %vm337_vm9, %v872_v17, %v334_v49  ;;  %vm417_vm0 = vmor %vm415_vm15, %vm416_vm13  ;;  %v451_v15 = vmul.f32 %v878_v6, %v1175_v38  ;;  %v359_v17 = vmul.f32 %v358_v1, %v1102_v42  ;;  %vm456_vm3 = vweird.f32 %v878_v6 }
 0x1de   :  { %v343_v51 = vsel %vm340_vm10, %v342_v45, %v338_v44  ;;  %v412_v56 = vsub.f32 1.0, %v411_v48  ;;  %v378_v2 = vsel %vm1186_vm14, %v1165_v9, %v374_v52  ;;  %v438_v9 = vadd.f32 1.1283791, %v437_v3  ;;  %vm457_vm5 = vmor %vm455_vm4, %vm456_vm3 }
 0x1df   :  { %v344_v50 = vmul.f32 %v343_v51, %v319_v46  ;;  %v383_v14 = vsel %vm380_vm2, %v382_v5, %v378_v2  ;;  %v452_v11 = vsub.f32 1.0, %v451_v15  ;;  %v864_v46 = vld [vmem:[%s1220_s6] ss:$0 sm:$0xff] }
 0x1e0   :  { %v413_v60 = vmul.f32 %v876_v39, %v412_v56  ;;  %v384_v20 = vmul.f32 %v383_v14, %v359_v17  ;;  %v439_v42 = vmul.f32 %v438_v9, %v1123_v62 }
 0x1e1   :  { %v741_v8 = vclamps-f32 %v344_v50, 1.0  ;;  %v453_v24 = vmul.f32 %v878_v6, %v452_v11 }
 0x1e2   :  { %v414_v4 = vadd.f32 %v876_v39, %v413_v60  ;;  %v742_v29 = vclamps-f32 %v384_v20, 1.0 }
 0x1e3   :  { %v467_v23 = vadd.f32 1.0, %v741_v8  ;;  %v454_v28 = vadd.f32 %v878_v6, %v453_v24 }
 0x1e4   :  { %v418_v13 = vsel %vm417_vm0, %v876_v39, %v414_v4  ;;  %v468_v49 = vadd.f32 1.0, %v742_v29 }
 0x1e5   :  { %v423_v18 = vsel %vm420_vm1, %v422_v7, %v418_v13  ;;  %v471_v31 = vmul.f32 %v467_v23, %v299_v25  ;;  %v458_v33 = vsel %vm457_vm5, %v878_v6, %v454_v28 }
 0x1e6   :  { %v424_v19 = vmul.f32 %v423_v18, %v399_v0  ;;  %v463_v12 = vsel %vm460_vm6, %v462_v30, %v458_v33  ;;  %v472_v38 = vmul.f32 %v468_v49, %v300_v54 }
 0x1e7   :  { %v464_v35 = vmul.f32 %v463_v12, %v439_v42 }
 0x1e8   :  { %v743_v22 = vclamps-f32 %v424_v19, 1.0 }
 0x1e9   :  { %v744_v40 = vclamps-f32 %v464_v35, 1.0 }
 0x1ea   :  { %v469_v27 = vadd.f32 1.0, %v743_v22 }
 0x1eb   :  { %v470_v37 = vadd.f32 1.0, %v744_v40 }
 0x1ec   :  { %v473_v32 = vmul.f32 %v469_v27, %v301_v26 }
 0x1ed   :  { %v474_v62 = vmul.f32 %v470_v37, %v302_v36 }
 0x1ee   :  { %v477_v34 = vpack.c.bf16 %v473_v32, %v471_v31 }
 0x1ef   :  { %v478_v39 = vpack.c.bf16 %v474_v62, %v472_v38 }
 0x1f0   :  { %615 = vmatmul.bf16.vlgmr.msra.gmra.mxu2 %v477_v34 }
 0x1f1   :  { %629 = vmatmul.bf16.vlgmr.msra.gmra.mxu3 %v478_v39 }
 0x273   :  { %v616_v43 = vpop.f32.mrf.mxu2 }
 0x274   :  { %v630_v44 = vpop.f32.mrf.mxu3 }
 0x275   :  { %v631_v45 = vadd.f32 %v630_v44, %v616_v43 }
 0x277   :  { %v648_v47 = vadd.f32 %v864_v46, %v631_v45 }
 0x279   :  { %650 = vst [vmem:[#allocation11] sm:$0xff] %v648_v47 }
 0x27b   :  { %v618_v48 = vpop.f32.mrf.mxu2 }
 0x27c   :  { %v632_v51 = vpop.f32.mrf.mxu3 }
 0x27d   :  { %v633_v52 = vadd.f32 %v632_v51, %v618_v48 }
 0x27f   :  { %v649_v16 = vadd.f32 %v864_v46, %v633_v52 }
 0x281   :  { %651 = vst [vmem:[#allocation11 + $0x8] sm:$0xff] %v649_v16 }
 0x282   :  { %664 = dma.vmem_to_hbm [thread:$0]  %s657_s26, 256, %s659_s29, [#allocation5], %s1012_s19, %s1012_s19, %s1013_s20  }
 0x283   :  { %1005 = dma.done.wait [#allocation5], 256  }
 0x284   :  { %1006 = vsyncadd [#allocation5], 4294967040 }
 0x285   :  { %669 = vsyncpa [#allocation4], 1 }
 0x286   :  { %670 = vsyncpa [#allocation7], 1 }
 0x287   :  { %671 = vsyncpa [#allocation10], 1 }
 0x288   :  { %672 = vsyncpa [#allocation5], 1 }

</bundles_post_ra>
